<compile_context>
chip_gen: v7x
topology: tpu7x:2x2x1
jax: 0.10.0
libtpu: 0.0.40
codegen_flags: <defaults>
</compile_context>

<pallas_src>
import math

import jax
import jax.numpy as jnp
from jax.experimental import pallas as pl
from jax.experimental.pallas import tpu as pltpu


def _loss_mul_kernel(out_ref, gt_ref, valid_ref, loss_ref):
    # Pure VPU elementwise path; f32 intermediates.  The valid block is either
    # the same shape as the data block or (TB, 1), in which case the multiply
    # lane-broadcasts on the VPU.
    d = out_ref[...].astype(jnp.float32) - gt_ref[...].astype(jnp.float32)
    v = valid_ref[...].astype(jnp.float32)
    loss_ref[...] = (jnp.abs(d) * v).astype(loss_ref.dtype)


def _loss_packed_colvalid_kernel(out_ref, gt_ref, valid_ref, expand_ref, loss_ref):
    # Lane-dense layout: data block (TB, P*pack), valid block (TB, pack).
    # Expand valid across the P lanes owned by each packed sub-row with a
    # one-hot (pack, P*pack) matmul -> rides on the otherwise-idle MXU and is
    # exact for 0/1 values.
    d = out_ref[...].astype(jnp.float32) - gt_ref[...].astype(jnp.float32)
    v = jnp.dot(valid_ref[...].astype(jnp.float32), expand_ref[...],
                preferred_element_type=jnp.float32)
    loss_ref[...] = (jnp.abs(d) * v).astype(loss_ref.dtype)


def _round_up(x, m):
    return ((x + m - 1) // m) * m


def _choose_tile_rows(rows, row_bytes, block_rows, target_bytes=1 << 20):
    """Batch-tile height: ~1 MiB per input stream, a multiple of 8, and at most
    ceil(rows/2) (rounded up to 8) so the grid has >= 2 parallel steps and both
    v7x TensorCores get work (no-op on single-TC v5e/v6e)."""
    if rows <= 8:
        return rows                                   # single full block
    target = max(8, min(block_rows, target_bytes // max(row_bytes, 1)))
    target = max(8, (target // 8) * 8)
    half = max(8, _round_up(pl.cdiv(rows, 2), 8))
    tb = min(target, half)
    return rows if tb >= rows else tb


def param_loss(param_out, param_gt, valid, *, block_rows=4096,
               min_kernel_bytes=256 * 1024):
    """Pallas implementation of ParamLoss.forward: |param_out - param_gt| * valid.

    param_out, param_gt: (B, P) arrays (same shape)
    valid: broadcastable against (B, P) — typically (B, P), (B, 1) or (B,)
    returns: (B, P) loss in param_out's dtype
    """
    assert param_out.ndim == 2 and param_out.shape == param_gt.shape
    B, P = param_out.shape
    out_dtype = param_out.dtype
    itemsize = jnp.dtype(out_dtype).itemsize

    valid = jnp.asarray(valid)
    if valid.dtype == jnp.bool_:
        valid = valid.astype(jnp.float32)      # tiny; avoids bool VMEM blocks
    if valid.ndim == 1:                        # (B,) -> (B, 1), metadata only
        valid = valid[:, None]
    col_valid = valid.shape == (B, 1)
    if not col_valid and valid.shape != (B, P):
        valid = jnp.broadcast_to(valid, (B, P))   # rare broadcast patterns

    # Small-problem fallback: launch + prologue dominates the math, and a
    # standalone custom call blocks XLA fusion with neighbouring ops.
    if B * P * itemsize < min_kernel_bytes:
        d = jnp.abs(param_out.astype(jnp.float32) - param_gt.astype(jnp.float32))
        return (d * valid.astype(jnp.float32)).astype(out_dtype)

    # Lane-dense repack: (B, P) -> (B/pack, P*pack) with P*pack % 128 == 0.
    pack = 128 // math.gcd(P, 128)
    use_pack = pack > 1 and (B % pack == 0)

    if use_pack:
        rows, cols = B // pack, P * pack
        po = param_out.reshape(rows, cols)     # row-major -> metadata-only
        pg = param_gt.reshape(rows, cols)
    else:
        rows, cols = B, P
        po, pg = param_out, param_gt

    TB = _choose_tile_rows(rows, cols * itemsize, block_rows)
    grid = (pl.cdiv(rows, TB),)
    data_spec = pl.BlockSpec((TB, cols), lambda i: (i, 0))

    if use_pack and col_valid:
        v = valid.reshape(rows, pack)          # metadata-only
        lane_owner = jnp.arange(cols, dtype=jnp.int32) // P
        expand = (lane_owner[None, :] ==
                  jnp.arange(pack, dtype=jnp.int32)[:, None]).astype(jnp.float32)
        kernel = _loss_packed_colvalid_kernel
        operands = (po, pg, v, expand)
        in_specs = [data_spec, data_spec,
                    pl.BlockSpec((TB, pack), lambda i: (i, 0)),
                    pl.BlockSpec((pack, cols), lambda i: (0, 0))]
        extra_bytes = TB * pack * 4 + pack * cols * 4
    else:
        v = valid.reshape(rows, cols) if use_pack else valid   # (B,1) or (rows,cols)
        vw = v.shape[-1]
        kernel = _loss_mul_kernel
        operands = (po, pg, v)
        in_specs = [data_spec, data_spec,
                    pl.BlockSpec((TB, vw), lambda i: (i, 0))]
        extra_bytes = TB * vw * jnp.dtype(v.dtype).itemsize

    # Explicit VMEM budget: double-buffered in/out tiles + headroom; keeps the
    # same tiling legal on v7x (64 MiB physical, 32 MiB default scoped limit).
    tile_bytes = TB * cols * itemsize
    needed = 2 * (3 * tile_bytes + extra_bytes) + (2 << 20)
    vmem_limit = int(min(64 << 20, max(needed, 8 << 20)))

    loss = pl.pallas_call(
        kernel,
        out_shape=jax.ShapeDtypeStruct((rows, cols), out_dtype),
        grid_spec=pltpu.PrefetchScalarGridSpec(
            num_scalar_prefetch=0,
            grid=grid,
            in_specs=in_specs,
            out_specs=data_spec,
        ),
        compiler_params=pltpu.CompilerParams(
            dimension_semantics=("parallel",),   # batch tiles shard across TCs
            vmem_limit_bytes=vmem_limit,
        ),
    )(*operands)

    return loss.reshape(B, P) if use_pack else loss


if __name__ == "__main__":
    key = jax.random.PRNGKey(0)
    k1, k2, k3 = jax.random.split(key, 3)

    B, P = 256, 72   # small batch of 72 SMPL-style pose/shape params
    param_out = jax.random.normal(k1, (B, P), dtype=jnp.float32)
    param_gt = jax.random.normal(k2, (B, P), dtype=jnp.float32)
    valid_col = (jax.random.uniform(k3, (B, 1)) > 0.3).astype(jnp.float32)
    valid_full = jnp.broadcast_to(valid_col, (B, P))

    ref = jnp.abs(param_out - param_gt) * valid_col

    # 1) Default call at this small size -> jnp fallback path.
    out_fb = jax.block_until_ready(param_loss(param_out, param_gt, valid_col))
    assert out_fb.shape == (B, P)
    assert jnp.allclose(out_fb, ref, atol=1e-6), "mismatch (fallback path)"

    # 2) Forced Pallas: lane-dense packed layout + in-kernel (B,1) valid expansion.
    out_col = jax.block_until_ready(
        param_loss(param_out, param_gt, valid_col, min_kernel_bytes=0))
    assert jnp.allclose(out_col, ref, atol=1e-6), "mismatch (packed, column valid)"

    # 3) Forced Pallas: packed layout with full-shape (B, P) valid.
    out_full = jax.block_until_ready(
        param_loss(param_out, param_gt, valid_full, min_kernel_bytes=0))
    assert jnp.allclose(out_full, ref, atol=1e-6), "mismatch (packed, full valid)"

    # 4) Forced Pallas: unpacked path (B not divisible by the 16-row pack).
    Bu = 40
    ref_u = jnp.abs(param_out[:Bu] - param_gt[:Bu]) * valid_col[:Bu]
    out_u = jax.block_until_ready(
        param_loss(param_out[:Bu], param_gt[:Bu], valid_col[:Bu],
                   min_kernel_bytes=0))
    assert jnp.allclose(out_u, ref_u, atol=1e-6), "mismatch (unpacked, column valid)"

    print("KERNEL_OK")
</pallas_src>

<mosaic_0001>
module attributes {stable_mosaic.version = 11 : i64} {
  func.func @_loss_packed_colvalid_kernel(%arg0: i32, %arg1: memref<8x1152xf32, #tpu.memory_space<vmem>>, %arg2: memref<8x1152xf32, #tpu.memory_space<vmem>>, %arg3: memref<8x16xf32, #tpu.memory_space<vmem>>, %arg4: memref<16x1152xf32, #tpu.memory_space<vmem>>, %arg5: memref<8x1152xf32, #tpu.memory_space<vmem>>) attributes {dimension_semantics = [#tpu.dimension_semantics<parallel>], iteration_bounds = array<i64: 2>, scalar_prefetch = 0 : i64, scratch_operands = 0 : i64, tpu.core_type = #tpu.core_type<tc>, window_params = [{transform_indices = @transform_0, window_bounds = array<i64: 8, 1152>}, {transform_indices = @transform_1, window_bounds = array<i64: 8, 1152>}, {transform_indices = @transform_2, window_bounds = array<i64: 8, 16>}, {pipeline_mode = #tpu.pipeline_mode<synchronous>, transform_indices = @transform_3, window_bounds = array<i64: 16, 1152>}, {transform_indices = @transform_4, window_bounds = array<i64: 8, 1152>}]} {
    %c0 = arith.constant 0 : index
    %c0_0 = arith.constant 0 : index
    %0 = vector.load %arg1[%c0, %c0_0] : memref<8x1152xf32, #tpu.memory_space<vmem>>, vector<8x1152xf32>
    %c0_1 = arith.constant 0 : index
    %c0_2 = arith.constant 0 : index
    %1 = vector.load %arg2[%c0_1, %c0_2] : memref<8x1152xf32, #tpu.memory_space<vmem>>, vector<8x1152xf32>
    %2 = arith.subf %0, %1 : vector<8x1152xf32>
    %c0_3 = arith.constant 0 : index
    %c0_4 = arith.constant 0 : index
    %3 = vector.load %arg3[%c0_3, %c0_4] : memref<8x16xf32, #tpu.memory_space<vmem>>, vector<8x16xf32>
    %c0_5 = arith.constant 0 : index
    %c0_6 = arith.constant 0 : index
    %4 = vector.load %arg4[%c0_5, %c0_6] : memref<16x1152xf32, #tpu.memory_space<vmem>>, vector<16x1152xf32>
    %cst = arith.constant dense<0.000000e+00> : vector<8x1152xf32>
    %5 = tpu.matmul %3, %4, %cst {dimension_numbers = #tpu.dot_dimension_numbers<[1], [0], [0], [1], [0, 0, 1, 1], [], []>} : vector<8x16xf32>, vector<16x1152xf32>, vector<8x1152xf32> -> vector<8x1152xf32>
    %6 = math.absf %2 : vector<8x1152xf32>
    %7 = arith.mulf %6, %5 : vector<8x1152xf32>
    %c0_7 = arith.constant 0 : index
    %c0_8 = arith.constant 0 : index
    %8 = vector.load %arg5[%c0_7, %c0_8] : memref<8x1152xf32, #tpu.memory_space<vmem>>, vector<8x1152xf32>
    tpu.vector_store %arg5[%c0_7, %c0_8], %7 {strides = array<i32>} : memref<8x1152xf32, #tpu.memory_space<vmem>>, vector<8x1152xf32>,
    return
  }
  func.func @transform_0(%arg0: i32) -> (i32, i32) {
    %c0_i32 = arith.constant 0 : i32
    %c0_i32_0 = arith.constant 0 : i32
    return %arg0, %c0_i32 : i32, i32
  }
  func.func @transform_1(%arg0: i32) -> (i32, i32) {
    %c0_i32 = arith.constant 0 : i32
    %c0_i32_0 = arith.constant 0 : i32
    return %arg0, %c0_i32 : i32, i32
  }
  func.func @transform_2(%arg0: i32) -> (i32, i32) {
    %c0_i32 = arith.constant 0 : i32
    %c0_i32_0 = arith.constant 0 : i32
    return %arg0, %c0_i32 : i32, i32
  }
  func.func @transform_3(%arg0: i32) -> (i32, i32) {
    %c0_i32 = arith.constant 0 : i32
    %c0_i32_0 = arith.constant 0 : i32
    %c0_i32_1 = arith.constant 0 : i32
    return %c0_i32, %c0_i32_0 : i32, i32
  }
  func.func @transform_4(%arg0: i32) -> (i32, i32) {
    %c0_i32 = arith.constant 0 : i32
    %c0_i32_0 = arith.constant 0 : i32
    return %arg0, %c0_i32 : i32, i32
  }
}

</mosaic_0001>

<bundles_post_ra>
// kernel: tpu_custom_call.1
= control target key start
LH: loop header
LB: loop body
LE: loop exit
PB: predicated region body
PF: predicated region fallthrough
CT: control target
= control target key end

     0   :  { %s1529_s0 = inlined_call_operand.hbm [shape: f32[16,1152], index: 0, kind: input, shape index: {}]   ;;  %s1530_s1 = inlined_call_operand.hbm [shape: f32[16,1152], index: 1, kind: input, shape index: {}]   ;;  %s1531_s2 = inlined_call_operand.hbm [shape: f32[16,16], index: 2, kind: input, shape index: {}]   ;;  %s1532_s3 = inlined_call_operand.hbm [shape: f32[16,1152], index: 3, kind: input, shape index: {}]   ;;  %s1533_s4 = inlined_call_operand.hbm [shape: f32[16,1152], index: 4, kind: output, shape index: {}]  }
   0x1   :  { %1546 = sst [smem:[#allocation18_spill]] %s1530_s1 }
   0x2   :  { %9 = vsyncpa [#allocation3], 0 }
   0x3   :  { %11 = vsyncpa [#allocation3 + $0x1], 0 }
   0x4   :  { %12 = vsyncpa [#allocation6], 0 }
   0x5   :  { %14 = vsyncpa [#allocation6 + $0x1], 0 }
   0x6   :  { %15 = vsyncpa [#allocation9], 0 }
   0x7   :  { %16 = vsyncpa [#allocation4], 0 }
   0x8   :  { %18 = vsyncpa [#allocation4 + $0x1], 0  ;;  %s1225_s15 = smov 0   ;;  %s1227_s16 = smov 0  }
   0x9   :  { %s1229_s17 = smov 0   ;;  %s1231_s18 = smov 0  }
   0xa LB: > { %1547 = sst [smem:[#allocation15_spill]] %s1184_s17  ;;  %s1246_s19 = sadd.s32 1, %s1188_s18   ;;  %s1188_s18 = sphi %s1231_s18, %s1570_s18   ;;  %s1184_s17 = sphi %s1229_s17, %s1572_s17   ;;  %s1180_s16 = sphi %s1227_s16, %s1574_s16   ;;  %s1176_s15 = sphi %s1225_s15, %s1573_s15  }
   0xb   : > { %1548 = sst [smem:[#allocation16_spill]] %s1246_s19  ;;  %s31_s20 = sadd.s32 1, %s1184_s17 }
   0xc   : > { %s28_s21 = ssub.s32 %s1188_s18, %s1246_s19  ;;  %p1534_p0 = scmp.ne.s32.totalorder %s1184_s17, %s1180_s16 }
   0xd   : > { %p29_p1 = scmp.eq.s32.totalorder %s28_s21, 0  ;;  %p39_p2 = scmp.eq.s32.totalorder %s1188_s18, 0 }
   0xe   : > { %p955_p4 = scmp.lt.s32.totalorder %s1188_s18, 2  ;;  %s1263_s23 = sand.u32 1, %s1184_s17  }
   0xf   : > { %s1257_s22 = scalar_select %p29_p1, %s1184_s17, %s31_s20  }
  0x10   : > { %p40_p5 = por %p39_p2, %p1534_p0  ;;  %s918_s24 = smul.u32 72, %s1263_s23 }
  0x11   : > { %1549 = sst [smem:[#allocation17_spill]] %s1257_s22  ;;  %s199_s25 = sand.u32 1, %s1188_s18  }
  0x12   : > { %s919_s26 = smul.u32 1152, %s1188_s18  ;;  %p1268_p6 = pnand %p955_p4, %p40_p5 }
  0x13   : > { %s1551_s1 = sld [smem:[#allocation18_spill]]  ;;  %s203_s5 = scalar_lea.vmem [#allocation5], %s918_s24 }
  0x14   : > { %s1550_s27 = scalar_select %p1268_p6, 1, 0 }
  0x15   : > { %s211_s6 = sshll.u32 %s203_s5, 4  ;;  %s1283_s7 = scalar_lea.sflag [#allocation6], %s199_s25  ;;  %s1281_s6 = int_to_ptr.vmem [resolvable:$true] %s211_s6 }
  0x16   : > { %p1289_p8 = pneg %p1268_p6 }
  0x18   : > { %s1552_s9 = scalar_select %p1289_p8, 1, 0 }
  0x19   : > { %s1277_s30 = scalar_lea.hbm %s1551_s1, %s919_s26  ;;  %s1001_s12 = scalar_lea.hbm %s1551_s1, 2304 }
  0x1a   : > { %s996_s8 = scalar_lea.hbm %s1277_s30, 1152  ;;  %p1002_p11 = scmp.lt.u32.totalorder %s1277_s30, %s1551_s1 }
  0x1b   : > { %p997_p7 = scmp.ne.s32.totalorder %s1277_s30, %s996_s8  ;;  %p1003_p12 = scmp.lt.u32.totalorder %s1001_s12, %s996_s8 }
  0x1c   : > { %p1005_p1 = scmp.lt.u32.totalorder %s996_s8, %s1277_s30 }
  0x1d   : > { %p999_p9 = pnand %p1289_p8, %p997_p7  ;;  %p1004_p13 = por %p1003_p12, %p1002_p11 }
  0x1f   : > { %p1000_p10 = pneg %p999_p9  ;;  %p1006_p2 = por %p1005_p1, %p1004_p13 }
  0x21   : > { %p1007_p4 = pnand %p1006_p2, %p1000_p10 }
  0x23   : > { %1010 = shalt.err (!%p1007_p4)
}
  0x24   : > { %s1011_s20 = scalar_lea.vmem %s1281_s6, 1152  ;;  %s1190_s21 = smov [#allocation5]  }
  0x25   : > { %p1012_p5 = scmp.ne.s32.totalorder %s1281_s6, %s1011_s20  ;;  %s1016_s25 = sshll.u32 %s1190_s21, 4  ;;  %s1017_s25 = int_to_ptr.vmem [resolvable:$false] %s1016_s25 }
  0x26   : > { %s1018_s28 = scalar_lea.vmem %s1017_s25, 2304  ;;  %p1019_p3 = scmp.lt.s32.totalorder %s1281_s6, %s1017_s25 }
  0x27   : > { %p1014_p7 = pnand %p1012_p5, %p1289_p8  ;;  %p1020_p0 = scmp.lt.s32.totalorder %s1018_s28, %s1011_s20 }
  0x29   : > { %p1015_p9 = pneg %p1014_p7  ;;  %p1021_p11 = por %p1020_p0, %p1019_p3 }
  0x2b   : > { %p1022_p12 = pnand %p1021_p11, %p1015_p9 }
  0x2d   : > { %1025 = shalt.err (!%p1022_p12)
}
  0x2e   : > { %946 = dma.hbm_to_vmem [thread:$0]  (!%p1268_p6), %s1277_s30, 1152, %s1281_s6, %s1283_s7  }
  0x2f   : > { %s1314_s29 = sadd.s32 4294967295, %s1188_s18   ;;  %s870_s5 = sadd.s32 4294967294, %s1188_s18  }
  0x30   : > { %p44_p0 = scmp.ne.s32.totalorder %s1180_s16, %s1176_s15  ;;  %p1536_p3 = scmp.eq.s32.totalorder %s1314_s29, 0 }
  0x31   : > { %p141_p10 = scmp.eq.s32.totalorder %s1314_s29, 1  ;;  %p147_p13 = scmp.eq.s32.totalorder %s870_s5, 1 }
  0x32   : > { %p1323_p1 = por %p1536_p3, %p44_p0  ;;  %p871_p2 = scmp.ge.s32.totalorder %s1188_s18, 1 }
  0x33   : > { %p1554_p4 = scmp.ne.s32.totalorder %s1184_s17, %s1180_s16  ;;  %p1335_p7 = por %p147_p13, %p44_p0 }
  0x34   : > { %s1553_s8 = scalar_select %p1323_p1, 1, 0 }
  0x35   : > { %p1331_p5 = por %p141_p10, %p1554_p4  ;;  %p154_p9 = scmp.lt.s32.totalorder %s1188_s18, 3 }
  0x36   : > { %s1556_s6 = scalar_select %p1335_p7, 1, 0 }
  0x37   : > { %s1555_s30 = scalar_select %p1331_p5, 1, 0 }
  0x38   : > { %p1340_p11 = pnand %p871_p2, %p154_p9  ;;  %s1191_s11 = smov [#allocation8]  }
  0x39   : > { %s166_s12 = sshll.u32 %s1191_s11, 4  ;;  %s1353_s20 = scalar_lea.hbm %s1529_s0, %s919_s26  ;;  %s1344_s12 = int_to_ptr.vmem [resolvable:$true] %s166_s12 }
  0x3a   : > { %s1557_s10 = scalar_select %p1340_p11, 1, 0 }
  0x3b   : > { %p936_p12 = pneg %p1340_p11  ;;  %s184_s25 = scalar_lea.vmem [#allocation2], %s918_s24 }
  0x3c   : > { %s192_s28 = sshll.u32 %s184_s25, 4  ;;  %s1026_s22 = scalar_lea.hbm %s1532_s3, 2304  ;;  %s1363_s28 = int_to_ptr.vmem [resolvable:$true] %s192_s28 }
  0x3d   : > { %p1357_p0 = pnand %p936_p12, %p1536_p3  ;;  %p1027_p10 = scmp.ne.s32.totalorder %s1532_s3, %s1026_s22 }
  0x3e   : > { %p1033_p9 = scmp.lt.u32.totalorder %s1026_s22, %s1532_s3 }
  0x3f   : > { %p1028_p13 = pneg %p1357_p0 }
  0x41   : > { %p1029_p2 = pnand %p1028_p13, %p1027_p10 }
  0x43   : > { %p1030_p4 = pneg %p1029_p2 }
  0x45   : > { %p1035_p12 = pnand %p1033_p9, %p1030_p4 }
  0x47   : > { %1038 = shalt.err (!%p1035_p12)
}
  0x48   : > { %s1039_s24 = scalar_lea.vmem %s1344_s12, 2304  ;;  %p1047_p1 = scmp.lt.s32.totalorder %s1344_s12, %s1344_s12 }
  0x49   : > { %p1040_p3 = scmp.ne.s32.totalorder %s1344_s12, %s1039_s24  ;;  %p1048_p11 = scmp.lt.s32.totalorder %s1039_s24, %s1039_s24 }
  0x4b   : > { %p1042_p7 = pnand %p1040_p3, %p1028_p13  ;;  %p1049_p6 = por %p1048_p11, %p1047_p1 }
  0x4d   : > { %p1043_p5 = pneg %p1042_p7 }
  0x4f   : > { %p1050_p8 = pnand %p1049_p6, %p1043_p5 }
  0x51   : > { %1053 = shalt.err (!%p1050_p8)
}
  0x52   : > { %s1192_s1 = smov 1152   ;;  %s1193_s17 = smov 72  }
  0x53   : > { %939 = dma.hbm_to_vmem [thread:$0]  (!%p1357_p0), %s1532_s3, 2304, %s1344_s12, [#allocation9], %s1192_s1, %s1192_s1, %s1193_s17  }
  0x54   : > { %s181_s11 = scalar_lea.sflag [#allocation3], %s1263_s23  ;;  %s1054_s13 = scalar_lea.hbm %s1353_s20, 1152 }
  0x55   : > { %p1055_p3 = scmp.ne.s32.totalorder %s1353_s20, %s1054_s13  ;;  %p1559_p6 = scmp.ne.s32.totalorder %s1552_s9, 0 }
  0x56   : > { %s1059_s24 = scalar_lea.hbm %s1529_s0, 2304  ;;  %p1060_p5 = scmp.lt.u32.totalorder %s1353_s20, %s1529_s0 }
  0x57   : > { %p1057_p8 = pnand %p1055_p3, %p1559_p6  ;;  %p1061_p7 = scmp.lt.u32.totalorder %s1059_s24, %s1054_s13 }
  0x58   : > { %p1063_p10 = scmp.lt.u32.totalorder %s1054_s13, %s1353_s20 }
  0x59   : > { %p1058_p1 = pneg %p1057_p8  ;;  %p1062_p11 = por %p1061_p7, %p1060_p5 }
  0x5b   : > { %p1064_p13 = por %p1063_p10, %p1062_p11 }
  0x5d   : > { %p1065_p2 = pnand %p1064_p13, %p1058_p1 }
  0x5f   : > { %1068 = shalt.err (!%p1065_p2)
}
  0x60   : > { %s1069_s12 = scalar_lea.vmem %s1363_s28, 1152  ;;  %s1194_s21 = smov [#allocation2]  }
  0x61   : > { %p1070_p0 = scmp.ne.s32.totalorder %s1363_s28, %s1069_s12  ;;  %s1074_s1 = sshll.u32 %s1194_s21, 4  ;;  %s1075_s1 = int_to_ptr.vmem [resolvable:$false] %s1074_s1 }
  0x62   : > { %s1076_s19 = scalar_lea.vmem %s1075_s1, 2304  ;;  %p1077_p12 = scmp.lt.s32.totalorder %s1363_s28, %s1075_s1 }
  0x63   : > { %p1072_p4 = pnand %p1070_p0, %p1559_p6  ;;  %p1078_p3 = scmp.lt.s32.totalorder %s1076_s19, %s1069_s12 }
  0x65   : > { %p1073_p9 = pneg %p1072_p4  ;;  %p1079_p8 = por %p1078_p3, %p1077_p12 }
  0x67   : > { %p1080_p5 = pnand %p1079_p8, %p1073_p9 }
  0x69   : > { %1083 = shalt.err (!%p1080_p5)
}
  0x6a   : > { %p1560_p1 = scmp.ne.s32.totalorder %s1550_s27, 0  ;;  %s877_s5 = sshll.u32 %s1188_s18, 7 }
  0x6b   : > { %s1561_s17 = sshll.u32 %s1263_s23, 3  ;;  %s227_s14 = scalar_lea.hbm %s1531_s2, %s877_s5 }
  0x6c   : > { %943 = dma.hbm_to_vmem [thread:$0]  (!%p1560_p1), %s1353_s20, 1152, %s1363_s28, %s181_s11  }
  0x6d   : > { %s222_s22 = scalar_lea.vmem [#allocation7], %s1561_s17  ;;  %s1084_s24 = scalar_lea.hbm %s227_s14, 128 }
  0x6e   : > { %s229_s25 = sshll.u32 %s222_s22, 4  ;;  %p1085_p7 = scmp.ne.s32.totalorder %s227_s14, %s1084_s24  ;;  %s230_s25 = int_to_ptr.vmem [resolvable:$true] %s229_s25 }
  0x6f   : > { %s1089_s1 = scalar_lea.hbm %s1531_s2, 256  ;;  %p1090_p13 = scmp.lt.u32.totalorder %s227_s14, %s1531_s2 }
  0x70   : > { %p1087_p11 = pnand %p1085_p7, %p1559_p6  ;;  %p1091_p2 = scmp.lt.u32.totalorder %s1089_s1, %s1084_s24 }
  0x71   : > { %p1093_p4 = scmp.lt.u32.totalorder %s1084_s24, %s227_s14 }
  0x72   : > { %p1088_p10 = pneg %p1087_p11  ;;  %p1092_p0 = por %p1091_p2, %p1090_p13 }
  0x74   : > { %p1094_p9 = por %p1093_p4, %p1092_p0 }
  0x76   : > { %p1095_p12 = pnand %p1094_p9, %p1088_p10 }
  0x78   : > { %1098 = shalt.err (!%p1095_p12)
}
  0x79   : > { %s1099_s23 = scalar_lea.vmem %s230_s25, 128  ;;  %s1195_s28 = smov [#allocation7]  }
  0x7a   : > { %p1100_p3 = scmp.ne.s32.totalorder %s230_s25, %s1099_s23  ;;  %s1104_s11 = sshll.u32 %s1195_s28, 4  ;;  %s1105_s11 = int_to_ptr.vmem [resolvable:$false] %s1104_s11 }
  0x7b   : > { %s1106_s5 = scalar_lea.vmem %s1105_s11, 256  ;;  %p1107_p7 = scmp.lt.s32.totalorder %s230_s25, %s1105_s11 }
  0x7c   : > { %p1102_p8 = pnand %p1100_p3, %p1559_p6  ;;  %p1108_p11 = scmp.lt.s32.totalorder %s1106_s5, %s1099_s23 }
  0x7e   : > { %p1103_p5 = pneg %p1102_p8  ;;  %p1109_p1 = por %p1108_p11, %p1107_p7 }
  0x80   : > { %p1110_p2 = pnand %p1109_p1, %p1103_p5 }
  0x82   : > { %1113 = shalt.err (!%p1110_p2)
}
  0x83   : > { %p1562_p13 = scmp.ne.s32.totalorder %s1550_s27, 0  ;;  %p1563_p10 = scmp.ne.s32.totalorder %s1557_s10, 0 }
  0x84   : > { %s1431_s9 = sand.u32 (!%p1563_p10), 1, %s1180_s16   ;;  %p1564_p6 = scmp.ne.s32.totalorder (!%p1563_p10), %s1553_s8, 0 }
  0x85   : > { %949 = dma.hbm_to_vmem [thread:$0]  (!%p1562_p13), %s227_s14, 128, %s230_s25, %s1283_s7  }
  0x86   : > { %238 = sbr.rel (%p1563_p10) target bundleno = 391 (0x187), region = 36  ;;  %s241_s22 = scalar_lea.sflag (!%p1563_p10), [#allocation3], %s1431_s9 }
  0x87   : > { %s1434_s17 = smul.u32 (!%p1563_p10), 72, %s1431_s9 }
  0x89   : > { %s1438_s13 = scalar_lea.vmem (!%p1563_p10), [#allocation2], %s1434_s17 }
  0x8d   : > { %1159 = dma.done.wait (%p1564_p6), %s241_s22, 1152  }
  0x8e   : > { %1161 = vsyncadd (%p1564_p6), %s241_s22, 4294966144  ;;  %s249_s27 = sand.u32 1, %s1314_s29   ;;  %s1446_s10 = scalar_lea.vmem [#allocation5], %s1434_s17 }
  0x8f   : > { %s250_s7 = scalar_lea.sflag [#allocation6], %s249_s27 }
  0x90   : > { %1163 = dma.done.wait (%p1564_p6), %s250_s7, 1280  }
  0x91   : > { %1165 = vsyncadd (%p1564_p6), %s250_s7, 4294966016  ;;  %s879_s25 = sshll.u32 %s1431_s9, 3  ;;  %p1565_p1 = scmp.eq.s32.totalorder %s1314_s29, 0 }
  0x92   : > { %s262_s26 = scalar_lea.vmem [#allocation7], %s879_s25 }
  0x93   : > { %1167 = dma.done.wait (%p1565_p1), [#allocation9], 2304   ;;  %p1566_p0 = pmov %p1565_p1 }
  0x94   : > { %v1196_v0 = vmov 0.0   ;;  %v330_v1 = vld [vmem:[#allocation8 + $0x8] sm:$0xff]  ;;  %v339_v2 = vld [vmem:[#allocation8 + $0x50] sm:$0xff]  ;;  %v329_v3 = vld [vmem:[#allocation8] sm:$0xff]  ;;  %vm347_vm0 = vcmask 130048   ;;  %v1197_v29 = vmov 0.0|0.0  }
  0x95   : > { %1169 = vsyncadd (%p1566_p0), [#allocation9], 4294964992  ;;  %415 = vmatprep.mubr.f32.mxu0 %v1196_v0  ;;  %486 = vmatprep.mubr.f32.mxu1 %v1196_v0  ;;  %v899_v4 = vpack.c.bf16 %v339_v2, %v330_v1  ;;  %v338_v5 = vld [vmem:[#allocation8 + $0x48] sm:$0xff]  ;;  %v332_v6 = vld [vmem:[#allocation8 + $0x18] sm:$0xff]  ;;  %vm1198_vm1 = vmmov 0   ;;  %s300_s8 = scalar_lea.vmem [#allocation10], %s1434_s17 }
  0x96   : > { %v341_v7 = vld [vmem:[#allocation8 + $0x60] sm:$0xff]  ;;  %v901_v8 = vpack.c.bf16 %v338_v5, %v329_v3  ;;  %v328_v10 = vld [vmem:[%s262_s26] sm:$0xff]  ;;  %v334_v14 = vld [vmem:[#allocation8 + $0x28] sm:$0xff]  ;;  %s923_s14 = smul.u32 1152, %s1314_s29  ;;  %s747_s24 = sshll.u32 %s300_s8, 4  ;;  %s1487_s24 = int_to_ptr.vmem [resolvable:$true] %s747_s24 }
  0x97   : > { %v903_v9 = vpack.c.bf16 %v341_v7, %v332_v6  ;;  %v331_v11 = vld [vmem:[#allocation8 + $0x10] sm:$0xff]  ;;  %v340_v12 = vld [vmem:[#allocation8 + $0x58] sm:$0xff]  ;;  %900 = vmatprep.subr.bf16.mxu0 %v899_v4  ;;  %v333_v16 = vld [vmem:[#allocation8 + $0x20] sm:$0xff]  ;;  %s733_s29 = scalar_lea.sflag [#allocation4], %s1431_s9  ;;  %s1114_s19 = scalar_lea.vmem %s1487_s24, 1152 }
  0x98   : > { %v905_v13 = vpack.c.bf16 %v340_v12, %v331_v11  ;;  %v343_v15 = vld [vmem:[#allocation8 + $0x70] sm:$0xff]  ;;  %902 = vmatpush1.bf16.msra.mxu0 %v901_v8  ;;  %v342_v18 = vld [vmem:[#allocation8 + $0x68] sm:$0xff]  ;;  %v336_v19 = vld [vmem:[#allocation8 + $0x38] sm:$0xff]  ;;  %s1485_s1 = scalar_lea.hbm %s1533_s4, %s923_s14  ;;  %p1115_p4 = scmp.ne.s32.totalorder %s1487_s24, %s1114_s19 }
  0x99   : > { %904 = vmatprep.subr.bf16.mxu1 %v903_v9  ;;  %v907_v17 = vpack.c.bf16 %v343_v15, %v334_v14  ;;  %v345_v20 = vld [vmem:[#allocation8 + $0x80] sm:$0xff]  ;;  %v909_v21 = vpack.c.bf16 %v342_v18, %v333_v16  ;;  %v335_v23 = vld [vmem:[#allocation8 + $0x30] sm:$0xff]  ;;  %v344_v24 = vld [vmem:[#allocation8 + $0x78] sm:$0xff]  ;;  %p1567_p9 = scmp.ne.s32.totalorder %s1555_s30, 0  ;;  %s1199_s20 = smov [#allocation10]  }
  0x9a   : > { %906 = vmatpush1.bf16.msra.mxu1 %v905_v13  ;;  %v911_v22 = vpack.c.bf16 %v345_v20, %v336_v19  ;;  %v337_v25 = vld [vmem:[#allocation8 + $0x40] sm:$0xff]  ;;  %v913_v26 = vpack.c.bf16 %v344_v24, %v335_v23  ;;  %v346_v27 = vld [vmem:[#allocation8 + $0x88] sm:$0xff]  ;;  %v301_v30 = vld [vmem:[%s1438_s13] sm:$0xff]  ;;  %s1118_s23 = sshll.u32 %s1199_s20, 4  ;;  %s1119_s23 = int_to_ptr.vmem [resolvable:$false] %s1118_s23 }
  0x9b   : > { %908 = vmatprep.subr.bf16.mxu0 %v907_v17  ;;  %881 = vmatmul.mubr.msk.f32.vlgmr.msra.gmra.mrb[0].mxu0 %vm347_vm0, %v328_v10  ;;  %v916_v28 = vpack.c.bf16 %v346_v27, %v337_v25  ;;  %v310_v31 = vld [vmem:[%s1446_s10] sm:$0xff]  ;;  %v302_v32 = vld [vmem:[%s1438_s13 + $0x8] sm:$0xff]  ;;  %v311_v33 = vld [vmem:[%s1446_s10 + $0x8] sm:$0xff]  ;;  %p1116_p12 = pnand %p1115_p4, %p1567_p9  ;;  %s1120_s28 = scalar_lea.vmem %s1119_s23, 2304 }
  0x9c   : > { %912 = vmatprep.subr.bf16.mxu1 %v911_v22  ;;  %910 = vmatpush1.bf16.msra.mxu0 %v909_v21  ;;  %v303_v34 = vld [vmem:[%s1438_s13 + $0x10] sm:$0xff]  ;;  %v312_v35 = vld [vmem:[%s1446_s10 + $0x10] sm:$0xff]  ;;  %v304_v36 = vld [vmem:[%s1438_s13 + $0x18] sm:$0xff]  ;;  %v319_v38 = vsub.f32 %v301_v30, %v310_v31  ;;  %v320_v39 = vsub.f32 %v302_v32, %v311_v33  ;;  %p1121_p8 = scmp.lt.s32.totalorder %s1487_s24, %s1119_s23  ;;  %p1122_p5 = scmp.lt.s32.totalorder %s1120_s28, %s1114_s19 }
  0x9d   : > { %882 = vmatmul.mubr.msk.f32.vlgmr.msra.gmra.mrb[0].mxu1 %vm347_vm0, %v328_v10  ;;  %557 = vmatprep.mubr.f32.mxu0 %v1196_v0  ;;  %v313_v37 = vld [vmem:[%s1446_s10 + $0x18] sm:$0xff]  ;;  %v321_v40 = vsub.f32 %v303_v34, %v312_v35  ;;  %v305_v41 = vld [vmem:[%s1438_s13 + $0x20] sm:$0xff]  ;;  %v314_v42 = vld [vmem:[%s1446_s10 + $0x20] sm:$0xff]  ;;  %p1117_p3 = pneg %p1116_p12 }
  0x9e   : > { %914 = vmatpush1.bf16.msra.mxu1 %v913_v26  ;;  %915 = vmatprep.subr.bf16.mxu0 %v1197_v29  ;;  %v306_v43 = vld [vmem:[%s1438_s13 + $0x28] sm:$0xff]  ;;  %v322_v44 = vsub.f32 %v304_v36, %v313_v37  ;;  %v315_v45 = vld [vmem:[%s1446_s10 + $0x28] sm:$0xff]  ;;  %v307_v46 = vld [vmem:[%s1438_s13 + $0x30] sm:$0xff]  ;;  %v705_v50 = vand.u32 2147483647, %v319_v38  ;;  %v323_v51 = vsub.f32 %v305_v41, %v314_v42  ;;  %p1123_p7 = por %p1122_p5, %p1121_p8 }
  0x9f   : > { %628 = vmatprep.mubr.f32.mxu1 %v1196_v0  ;;  %883 = vmatmul.mubr.msk.f32.vlgmr.msra.gmra.mrb[2].mxu0 %vm347_vm0, %v328_v10  ;;  %v316_v47 = vld [vmem:[%s1446_s10 + $0x30] sm:$0xff]  ;;  %v308_v48 = vld [vmem:[%s1438_s13 + $0x38] sm:$0xff]  ;;  %v317_v49 = vld [vmem:[%s1446_s10 + $0x38] sm:$0xff]  ;;  %v706_v52 = vand.u32 2147483647, %v320_v39  ;;  %v324_v54 = vsub.f32 %v306_v43, %v315_v45 }
  0xa0   : > { %917 = vmatpush3.bf16.msra.mxu0 %v916_v28  ;;  %896 = vmatprep.mubr.msk.f32.mxu0 %vm1198_vm1, %v1196_v0  ;;  %v707_v53 = vand.u32 2147483647, %v321_v40  ;;  %v325_v55 = vsub.f32 %v307_v46, %v316_v47  ;;  %v309_v56 = vld [vmem:[%s1438_s13 + $0x40] sm:$0xff]  ;;  %v318_v57 = vld [vmem:[%s1446_s10 + $0x40] sm:$0xff]  ;;  %v708_v58 = vand.u32 2147483647, %v322_v44  ;;  %v326_v59 = vsub.f32 %v308_v48, %v317_v49  ;;  %p1124_p11 = pnand %p1123_p7, %p1117_p3 }
  0xa1   : > { %884 = vmatmul.mubr.msk.f32.vlgmr.msra.gmra.mrb[2].mxu1 %vm347_vm0, %v328_v10  ;;  %v709_v0 = vand.u32 2147483647, %v323_v51  ;;  %v327_v1 = vsub.f32 %v309_v56, %v318_v57  ;;  %v710_v5 = vand.u32 2147483647, %v324_v54 }
  0xa2   : > { %v711_v6 = vand.u32 2147483647, %v325_v55  ;;  %v712_v8 = vand.u32 2147483647, %v326_v59 }
  0xa3   : > { %897 = vmatmul.mubr.msk.f32.vlgmr.msra.gmra.mrb[4].mxu0 %vm347_vm0, %v328_v10  ;;  %v713_v13 = vand.u32 2147483647, %v327_v1 }
 0x16e   : > { %v417_v60 = vpop.f32.mrb[0].mxu0 }
 0x16f   : > { %v714_v61 = vmul.f32 %v705_v50, %v417_v60  ;;  %v419_v62 = vpop.f32.mrb[1].mxu0 }
 0x170   : > { %v488_v63 = vpop.f32.mrb[0].mxu1  ;;  %v715_v2 = vmul.f32 %v706_v52, %v419_v62 }
 0x171   : > { %v716_v3 = vmul.f32 %v707_v53, %v488_v63  ;;  %v490_v4 = vpop.f32.mrb[1].mxu1  ;;  %723 = vst [vmem:[%s300_s8] sm:$0xff] %v714_v61 }
 0x172   : > { %v717_v7 = vmul.f32 %v708_v58, %v490_v4  ;;  %724 = vst [vmem:[%s300_s8 + $0x8] sm:$0xff] %v715_v2  ;;  %v559_v9 = vpop.f32.mrb[2].mxu0 }
 0x173   : > { %725 = vst [vmem:[%s300_s8 + $0x10] sm:$0xff] %v716_v3  ;;  %v718_v10 = vmul.f32 %v709_v0, %v559_v9  ;;  %v561_v11 = vpop.f32.mrb[3].mxu0 }
 0x174   : > { %726 = vst [vmem:[%s300_s8 + $0x18] sm:$0xff] %v717_v7  ;;  %v630_v12 = vpop.f32.mrb[2].mxu1  ;;  %v719_v14 = vmul.f32 %v710_v5, %v561_v11 }
 0x175   : > { %v720_v15 = vmul.f32 %v711_v6, %v630_v12  ;;  %v632_v16 = vpop.f32.mrb[3].mxu1  ;;  %727 = vst [vmem:[%s300_s8 + $0x20] sm:$0xff] %v718_v10 }
 0x176   : > { %v721_v17 = vmul.f32 %v712_v8, %v632_v16  ;;  %728 = vst [vmem:[%s300_s8 + $0x28] sm:$0xff] %v719_v14  ;;  %v701_v18 = vpop.f32.mrb[4].mxu0 }
 0x177   : > { %729 = vst [vmem:[%s300_s8 + $0x30] sm:$0xff] %v720_v15  ;;  %v722_v19 = vmul.f32 %v713_v13, %v701_v18  ;;  %v898_v20 = vpop.f32.mrb[5].mxu0 }
 0x178   : > { %730 = vst [vmem:[%s300_s8 + $0x38] sm:$0xff] %v721_v17 }
 0x179   : > { %731 = vst [vmem:[%s300_s8 + $0x40] sm:$0xff] %v722_v19 }
 0x17a   : > { %1127 = shalt.err (!%p1124_p11)
}
 0x17b   : > { %s1128_s11 = scalar_lea.hbm %s1485_s1, 1152  ;;  %s1132_s17 = scalar_lea.hbm %s1533_s4, 2304 }
 0x17c   : > { %p1129_p2 = scmp.ne.s32.totalorder %s1485_s1, %s1128_s11  ;;  %p1133_p6 = scmp.lt.u32.totalorder %s1485_s1, %s1533_s4 }
 0x17d   : > { %p1134_p1 = scmp.lt.u32.totalorder %s1132_s17, %s1128_s11  ;;  %p1136_p4 = scmp.lt.u32.totalorder %s1128_s11, %s1485_s1 }
 0x17e   : > { %p1130_p13 = pnand %p1129_p2, %p1567_p9 }
 0x17f   : > { %p1135_p0 = por %p1134_p1, %p1133_p6 }
 0x180   : > { %p1131_p10 = pneg %p1130_p13 }
 0x181   : > { %p1137_p12 = por %p1136_p4, %p1135_p0 }
 0x183   : > { %p1138_p3 = pnand %p1137_p12, %p1131_p10 }
 0x185   : > { %1141 = shalt.err (!%p1138_p3)
}
 0x186   : > { %934 = dma.vmem_to_hbm [thread:$0]  (%p1567_p9), %s1487_s24, 1152, %s1485_s1, %s733_s29  }
 0x187 PF: > { %s759_s27 = sand.u32 1, %s1176_s15   ;;  %p1568_p8 = scmp.ne.s32.totalorder %s1556_s6, 0 }
 0x188   : > { %p1569_p5 = scmp.ge.s32.totalorder %s1188_s18, 2  ;;  %s760_s7 = scalar_lea.sflag [#allocation4], %s759_s27 }
 0x18a   : > { %p951_p7 = pnand %p1569_p5, %p1568_p8 }
 0x18c   : > { %1171 = dma.done.wait (!%p951_p7), %s760_s7, 1152  }
 0x18d   : > { %1173 = vsyncadd (!%p951_p7), %s760_s7, 4294966144  ;;  %s1570_s18 = sld [smem:[#allocation16_spill]]  ;;  %s1571_s10 = sld [smem:[#allocation15_spill]] }
 0x18e   : > { %s1572_s17 = sld [smem:[#allocation17_spill]]  ;;  %s1573_s15 = smov %s1180_s16 }
 0x193   : > { %p21_p11 = scmp.ge.s32.totalorder %s1570_s18, 4   ;;  %s1574_s16 = smov %s1571_s10 }
 0x195   :  { %23 = sbr.rel (!%p21_p11) target bundleno = 10 (0xa), region = 109 }
 0x19c   :  { %765 = vsyncpa [#allocation3], 1 }
 0x19d   :  { %767 = vsyncpa [#allocation3 + $0x1], 1 }
 0x19e   :  { %768 = vsyncpa [#allocation6], 1 }
 0x19f   :  { %770 = vsyncpa [#allocation6 + $0x1], 1 }
 0x1a0   :  { %771 = vsyncpa [#allocation9], 1 }
 0x1a1   :  { %772 = vsyncpa [#allocation4], 1 }
 0x1a2   :  { %774 = vsyncpa [#allocation4 + $0x1], 1 }

</bundles_post_ra>
